<compile_context>
chip_gen: v5e
topology: v5e:2x2
jax: 0.10.0
libtpu: 0.0.40
codegen_flags: <defaults>
</compile_context>

<pallas_src>
import functools

import jax
import jax.numpy as jnp
from jax.experimental import pallas as pl
from jax.experimental.pallas import tpu as pltpu


def _cdiv(a, b):
    return -(-a // b)


def _round_up(a, b):
    return -(-a // b) * b


def _stats_kernel(c_half, x1_ref, x2_ref, w1_ref, w2_ref, stats_ref):
    # ReLU commutes with the strided slice / zero-pad done in the wrapper.
    xr1 = jnp.maximum(x1_ref[...], 0).astype(w1_ref.dtype)   # (C_in, tile_s)
    xr2 = jnp.maximum(x2_ref[...], 0).astype(w2_ref.dtype)
    # Weight-stationary matmuls: (C_half_pad, C_in) @ (C_in, tile_s); f32 acc.
    y1 = jnp.dot(w1_ref[...], xr1, preferred_element_type=jnp.float32)[:c_half]
    y2 = jnp.dot(w2_ref[...], xr2, preferred_element_type=jnp.float32)[:c_half]
    # Per-tile partial BN statistics (reduced in the wrapper).  Padded spatial
    # columns are zero and contribute nothing to the sums.
    stats_ref[:c_half, 0:1] = jnp.sum(y1, axis=1, keepdims=True)
    stats_ref[c_half:, 0:1] = jnp.sum(y2, axis=1, keepdims=True)
    stats_ref[:c_half, 1:2] = jnp.sum(y1 * y1, axis=1, keepdims=True)
    stats_ref[c_half:, 1:2] = jnp.sum(y2 * y2, axis=1, keepdims=True)


def _conv_bn_kernel(c_half, x1_ref, x2_ref, w1_ref, w2_ref,
                    scale_ref, shift_ref, o_ref):
    # Recompute the cheap ReLU + convs (reads 2*C_in values per output column)
    # instead of round-tripping the conv output through HBM.
    xr1 = jnp.maximum(x1_ref[...], 0).astype(w1_ref.dtype)
    xr2 = jnp.maximum(x2_ref[...], 0).astype(w2_ref.dtype)
    y1 = jnp.dot(w1_ref[...], xr1, preferred_element_type=jnp.float32)[:c_half]
    y2 = jnp.dot(w2_ref[...], xr2, preferred_element_type=jnp.float32)[:c_half]
    # Folded BatchNorm: out = y * scale + shift, written directly in NCHW
    # orientation (channels on sublanes, spatial on lanes).
    o_ref[:c_half, :] = (y1 * scale_ref[:c_half, :]
                         + shift_ref[:c_half, :]).astype(o_ref.dtype)
    o_ref[c_half:, :] = (y2 * scale_ref[c_half:, :]
                         + shift_ref[c_half:, :]).astype(o_ref.dtype)


def factorized_reduce(x, w1, w2, gamma, beta, *, stride=2, eps=1e-5,
                      compute_dtype=jnp.float32):
    """x: (N, C_in, H, W); w1, w2: (C_out//2, C_in, 1, 1); gamma/beta: (C_out,)."""
    N, C_in, H, W = x.shape
    C_half = w1.shape[0]
    C_out = 2 * C_half

    Ho = (H - 1) // stride + 1
    Wo = (W - 1) // stride + 1
    S = Ho * Wo
    M = N * S

    # conv_1 path: x[:, :, ::stride, ::stride].
    x1 = x[:, :, ::stride, ::stride]
    # conv_2 path: PyTorch pads right/bottom then takes [1:, 1:] then strides,
    # i.e. x[:, :, 1::stride, 1::stride]; pad only if the last sampled index
    # falls off the edge (odd H/W).
    ph = max(0, 1 + (Ho - 1) * stride - (H - 1))
    pw = max(0, 1 + (Wo - 1) * stride - (W - 1))
    xs = x if (ph == 0 and pw == 0) else jnp.pad(
        x, ((0, 0), (0, 0), (0, ph), (0, pw)))
    x2 = xs[:, :, 1::stride, 1::stride][:, :, :Ho, :Wo]

    # Keep NCHW-derived layout; reshape (free) to (N, C_in, S).  No transpose,
    # no concatenate — the kernel output is already NCHW.
    x1 = x1.reshape(N, C_in, S).astype(compute_dtype)
    x2 = x2.reshape(N, C_in, S).astype(compute_dtype)

    cb = jnp.dtype(compute_dtype).itemsize
    ob = jnp.dtype(x.dtype).itemsize

    # VMEM sizing: query physical VMEM; fall back to v7x's 64 MiB if unknown.
    try:
        vmem_phys = int(getattr(pltpu.get_tpu_info(), "vmem_capacity_bytes",
                                64 * 1024 * 1024))
    except Exception:
        vmem_phys = 64 * 1024 * 1024
    vmem_limit = min(int(vmem_phys * 0.7), 96 * 1024 * 1024)
    budget = vmem_limit // 2

    # Bytes resident per spatial (lane) column in pass 2 (the heavier pass):
    # double-buffered inputs + double-buffered output + f32 intermediates.
    per_col = 2 * C_in * cb * 2 + C_out * ob * 2 + 3 * C_out * 4
    cap_cols = max(128, (budget // per_col) // 128 * 128)

    if S <= 128:
        tile_s, n_s, S_pad = S, 1, S           # block == full extent, no pad
    else:
        max_tile = min(cap_cols, 8192)
        n_s = _cdiv(S, max_tile)
        if (N * n_s) % 2 == 1:                 # keep both v7x TensorCores busy
            n_s += 1
        tile_s = _round_up(_cdiv(S, n_s), 128)
        S_pad = n_s * tile_s
        if S_pad != S:
            # Padded columns are zero -> contribute nothing to the BN sums.
            pad = ((0, 0), (0, 0), (0, S_pad - S))
            x1 = jnp.pad(x1, pad)
            x2 = jnp.pad(x2, pad)

    # 1x1 conv weights in native (C_half, C_in) orientation (no transpose);
    # pad the output-channel (sublane) dim up to a multiple of 8.
    C_half_pad = _round_up(C_half, 8)
    w1m = jnp.zeros((C_half_pad, C_in), compute_dtype).at[:C_half].set(
        w1.reshape(C_half, C_in).astype(compute_dtype))
    w2m = jnp.zeros((C_half_pad, C_in), compute_dtype).at[:C_half].set(
        w2.reshape(C_half, C_in).astype(compute_dtype))

    grid = (N, n_s)
    dim_sem = ("parallel", "parallel")
    x_spec = pl.BlockSpec((None, C_in, tile_s), lambda n, s: (n, 0, s))
    w_spec = pl.BlockSpec((C_half_pad, C_in), lambda n, s: (0, 0))

    bytes_x = 2 * N * S_pad * C_in * cb
    bytes_w = 2 * C_half_pad * C_in * cb
    flops = 4 * N * S_pad * C_in * C_half      # two (C_half,C_in)@(C_in,S) dots

    # Pass 1: per-tile BN partial statistics only (no y round-trip to HBM).
    stats = pl.pallas_call(
        functools.partial(_stats_kernel, C_half),
        out_shape=jax.ShapeDtypeStruct((N, n_s, C_out, 2), jnp.float32),
        grid_spec=pltpu.PrefetchScalarGridSpec(
            num_scalar_prefetch=0,
            grid=grid,
            in_specs=[x_spec, x_spec, w_spec, w_spec],
            out_specs=pl.BlockSpec((None, None, C_out, 2),
                                   lambda n, s: (n, s, 0, 0)),
        ),
        compiler_params=pltpu.CompilerParams(
            dimension_semantics=dim_sem, vmem_limit_bytes=vmem_limit),
        cost_estimate=pl.CostEstimate(
            flops=flops, transcendentals=0,
            bytes_accessed=bytes_x + bytes_w + N * n_s * C_out * 2 * 4),
    )(x1, x2, w1m, w2m)

    # Reduce the partial stats and fold BN into one scale/shift per channel
    # (all scalar/vector math hoisted out of pass 2).
    ssum = jnp.sum(stats, axis=(0, 1))                       # (C_out, 2)
    mean = ssum[:, 0] / M
    # Biased variance (PyTorch BN normalization); clamp guards the f32
    # E[y^2]-E[y]^2 cancellation.
    var = jnp.maximum(ssum[:, 1] / M - mean * mean, 0.0)
    inv = jax.lax.rsqrt(var + eps)
    scale_vec = gamma.astype(jnp.float32) * inv
    shift_vec = beta.astype(jnp.float32) - mean * scale_vec
    scale = scale_vec.reshape(C_out, 1)
    shift = shift_vec.reshape(C_out, 1)
    sc_spec = pl.BlockSpec((C_out, 1), lambda n, s: (0, 0))

    # Pass 2: recompute ReLU + convs (cheap) and apply BN; write NCHW directly.
    out = pl.pallas_call(
        functools.partial(_conv_bn_kernel, C_half),
        out_shape=jax.ShapeDtypeStruct((N, C_out, S_pad), x.dtype),
        grid_spec=pltpu.PrefetchScalarGridSpec(
            num_scalar_prefetch=0,
            grid=grid,
            in_specs=[x_spec, x_spec, w_spec, w_spec, sc_spec, sc_spec],
            out_specs=pl.BlockSpec((None, C_out, tile_s),
                                   lambda n, s: (n, 0, s)),
        ),
        compiler_params=pltpu.CompilerParams(
            dimension_semantics=dim_sem, vmem_limit_bytes=vmem_limit),
        cost_estimate=pl.CostEstimate(
            flops=flops, transcendentals=0,
            bytes_accessed=bytes_x + bytes_w + 2 * C_out * 4
                           + N * S_pad * C_out * ob),
    )(x1, x2, w1m, w2m, scale, shift)

    if S_pad != S:
        out = out[:, :, :S]
    return out.reshape(N, C_out, Ho, Wo)


def factorized_reduce_ref(x, w1, w2, gamma, beta, *, stride=2, eps=1e-5):
    """Pure-JAX reference matching the PyTorch forward (training-mode BN)."""
    C_half = w1.shape[0]
    xr = jnp.maximum(x, 0.0)
    yp = jnp.pad(xr, ((0, 0), (0, 0), (0, 1), (0, 1)))
    a = jnp.einsum('nchw,oc->nohw', xr[:, :, ::stride, ::stride],
                   w1.reshape(C_half, -1))
    b = jnp.einsum('nchw,oc->nohw', yp[:, :, 1:, 1:][:, :, ::stride, ::stride],
                   w2.reshape(C_half, -1))
    out = jnp.concatenate([a, b], axis=1)
    mean = out.mean(axis=(0, 2, 3), keepdims=True)
    var = ((out - mean) ** 2).mean(axis=(0, 2, 3), keepdims=True)
    return ((out - mean) * jax.lax.rsqrt(var + eps)
            * gamma.reshape(1, -1, 1, 1) + beta.reshape(1, -1, 1, 1))


if __name__ == "__main__":
    N, C_in, H, W = 2, 4, 16, 16
    C_out = 8
    C_half = C_out // 2

    key = jax.random.PRNGKey(0)
    kx, kw1, kw2 = jax.random.split(key, 3)
    x = jax.random.normal(kx, (N, C_in, H, W), dtype=jnp.float32)
    # Conv2d(C_in, C_out//2, 1, stride=2, bias=False) weights: (C_half, C_in, 1, 1)
    w1 = jax.random.normal(kw1, (C_half, C_in, 1, 1), dtype=jnp.float32) * 0.5
    w2 = jax.random.normal(kw2, (C_half, C_in, 1, 1), dtype=jnp.float32) * 0.5
    # BatchNorm2d(affine=True) init: gamma=1, beta=0
    gamma = jnp.ones((C_out,), dtype=jnp.float32)
    beta = jnp.zeros((C_out,), dtype=jnp.float32)

    ref = jax.block_until_ready(factorized_reduce_ref(x, w1, w2, gamma, beta))

    # f32 path: tight check against the pure-JAX reference.
    fr_f32 = jax.jit(functools.partial(factorized_reduce,
                                       compute_dtype=jnp.float32))
    out = jax.block_until_ready(fr_f32(x, w1, w2, gamma, beta))
    assert out.shape == (N, C_out, H // 2, W // 2), out.shape
    assert jnp.allclose(out, ref, atol=1e-4, rtol=1e-4), float(
        jnp.max(jnp.abs(out - ref)))

    # bf16 activation/weight storage (halves kernel HBM traffic); matmul and BN
    # statistics still accumulate in f32, so only input rounding is lost.
    fr_bf16 = jax.jit(functools.partial(factorized_reduce,
                                        compute_dtype=jnp.bfloat16))
    out_bf16 = jax.block_until_ready(fr_bf16(x, w1, w2, gamma, beta))
    assert out_bf16.shape == (N, C_out, H // 2, W // 2), out_bf16.shape
    assert jnp.allclose(out_bf16, ref, atol=7.5e-2, rtol=7.5e-2), float(
        jnp.max(jnp.abs(out_bf16 - ref)))

    print("KERNEL_OK")
</pallas_src>

<mosaic_0001>
module attributes {stable_mosaic.version = 11 : i64} {
  func.func @_conv_bn_kernel(%arg0: i32, %arg1: i32, %arg2: memref<1x4x64xf32, #tpu.memory_space<vmem>>, %arg3: memref<1x4x64xf32, #tpu.memory_space<vmem>>, %arg4: memref<8x4xf32, #tpu.memory_space<vmem>>, %arg5: memref<8x4xf32, #tpu.memory_space<vmem>>, %arg6: memref<8x1xf32, #tpu.memory_space<vmem>>, %arg7: memref<8x1xf32, #tpu.memory_space<vmem>>, %arg8: memref<1x8x64xf32, #tpu.memory_space<vmem>>) attributes {dimension_semantics = [#tpu.dimension_semantics<parallel>, #tpu.dimension_semantics<parallel>], iteration_bounds = array<i64: 2, 1>, scalar_prefetch = 0 : i64, scratch_operands = 0 : i64, tpu.core_type = #tpu.core_type<tc>, window_params = [{transform_indices = @transform_0, window_bounds = array<i64: 1, 4, 64>}, {transform_indices = @transform_1, window_bounds = array<i64: 1, 4, 64>}, {pipeline_mode = #tpu.pipeline_mode<synchronous>, transform_indices = @transform_2, window_bounds = array<i64: 8, 4>}, {pipeline_mode = #tpu.pipeline_mode<synchronous>, transform_indices = @transform_3, window_bounds = array<i64: 8, 4>}, {pipeline_mode = #tpu.pipeline_mode<synchronous>, transform_indices = @transform_4, window_bounds = array<i64: 8, 1>}, {pipeline_mode = #tpu.pipeline_mode<synchronous>, transform_indices = @transform_5, window_bounds = array<i64: 8, 1>}, {transform_indices = @transform_6, window_bounds = array<i64: 1, 8, 64>}]} {
    %c0 = arith.constant 0 : index
    %c0_0 = arith.constant 0 : index
    %c0_1 = arith.constant 0 : index
    %0 = vector.load %arg2[%c0, %c0_0, %c0_1] : memref<1x4x64xf32, #tpu.memory_space<vmem>>, vector<1x4x64xf32>
    %1 = vector.shape_cast %0 : vector<1x4x64xf32> to vector<4x64xf32>
    %cst = arith.constant 0.000000e+00 : f32
    %2 = vector.broadcast %cst : f32 to vector<4x64xf32>
    %3 = arith.maximumf %1, %2 : vector<4x64xf32>
    %c0_2 = arith.constant 0 : index
    %c0_3 = arith.constant 0 : index
    %c0_4 = arith.constant 0 : index
    %4 = vector.load %arg3[%c0_2, %c0_3, %c0_4] : memref<1x4x64xf32, #tpu.memory_space<vmem>>, vector<1x4x64xf32>
    %5 = vector.shape_cast %4 : vector<1x4x64xf32> to vector<4x64xf32>
    %cst_5 = arith.constant 0.000000e+00 : f32
    %6 = vector.broadcast %cst_5 : f32 to vector<4x64xf32>
    %7 = arith.maximumf %5, %6 : vector<4x64xf32>
    %c0_6 = arith.constant 0 : index
    %c0_7 = arith.constant 0 : index
    %8 = vector.load %arg4[%c0_6, %c0_7] : memref<8x4xf32, #tpu.memory_space<vmem>>, vector<8x4xf32>
    %cst_8 = arith.constant dense<0.000000e+00> : vector<8x64xf32>
    %9 = tpu.matmul %8, %3, %cst_8 {dimension_numbers = #tpu.dot_dimension_numbers<[1], [0], [0], [1], [0, 0, 1, 1], [], []>} : vector<8x4xf32>, vector<4x64xf32>, vector<8x64xf32> -> vector<8x64xf32>
    %10 = vector.extract_strided_slice %9 {offsets = [0, 0], sizes = [4, 64], strides = [1, 1]} : vector<8x64xf32> to vector<4x64xf32>
    %c0_9 = arith.constant 0 : index
    %c0_10 = arith.constant 0 : index
    %11 = vector.load %arg5[%c0_9, %c0_10] : memref<8x4xf32, #tpu.memory_space<vmem>>, vector<8x4xf32>
    %cst_11 = arith.constant dense<0.000000e+00> : vector<8x64xf32>
    %12 = tpu.matmul %11, %7, %cst_11 {dimension_numbers = #tpu.dot_dimension_numbers<[1], [0], [0], [1], [0, 0, 1, 1], [], []>} : vector<8x4xf32>, vector<4x64xf32>, vector<8x64xf32> -> vector<8x64xf32>
    %13 = vector.extract_strided_slice %12 {offsets = [0, 0], sizes = [4, 64], strides = [1, 1]} : vector<8x64xf32> to vector<4x64xf32>
    %c0_12 = arith.constant 0 : index
    %c0_13 = arith.constant 0 : index
    %14 = vector.load %arg6[%c0_12, %c0_13] : memref<8x1xf32, #tpu.memory_space<vmem>>, vector<4x1xf32>
    %15 = vector.broadcast %14 : vector<4x1xf32> to vector<4x64xf32>
    %16 = arith.mulf %10, %15 : vector<4x64xf32>
    %c0_14 = arith.constant 0 : index
    %c0_15 = arith.constant 0 : index
    %17 = vector.load %arg7[%c0_14, %c0_15] : memref<8x1xf32, #tpu.memory_space<vmem>>, vector<4x1xf32>
    %18 = vector.broadcast %17 : vector<4x1xf32> to vector<4x64xf32>
    %19 = arith.addf %16, %18 : vector<4x64xf32>
    %c0_16 = arith.constant 0 : index
    %c0_17 = arith.constant 0 : index
    %c0_18 = arith.constant 0 : index
    %20 = vector.load %arg8[%c0_16, %c0_17, %c0_18] : memref<1x8x64xf32, #tpu.memory_space<vmem>>, vector<1x4x64xf32>
    %21 = vector.shape_cast %20 : vector<1x4x64xf32> to vector<4x64xf32>
    %22 = vector.shape_cast %19 : vector<4x64xf32> to vector<1x4x64xf32>
    tpu.vector_store %arg8[%c0_16, %c0_17, %c0_18], %22 {strides = array<i32>} : memref<1x8x64xf32, #tpu.memory_space<vmem>>, vector<1x4x64xf32>,
    %c4 = arith.constant 4 : index
    %c0_19 = arith.constant 0 : index
    %23 = vector.load %arg6[%c4, %c0_19] : memref<8x1xf32, #tpu.memory_space<vmem>>, vector<4x1xf32>
    %24 = vector.broadcast %23 : vector<4x1xf32> to vector<4x64xf32>
    %25 = arith.mulf %13, %24 : vector<4x64xf32>
    %c4_20 = arith.constant 4 : index
    %c0_21 = arith.constant 0 : index
    %26 = vector.load %arg7[%c4_20, %c0_21] : memref<8x1xf32, #tpu.memory_space<vmem>>, vector<4x1xf32>
    %27 = vector.broadcast %26 : vector<4x1xf32> to vector<4x64xf32>
    %28 = arith.addf %25, %27 : vector<4x64xf32>
    %c0_22 = arith.constant 0 : index
    %c4_23 = arith.constant 4 : index
    %c0_24 = arith.constant 0 : index
    %29 = vector.load %arg8[%c0_22, %c4_23, %c0_24] : memref<1x8x64xf32, #tpu.memory_space<vmem>>, vector<1x4x64xf32>
    %30 = vector.shape_cast %29 : vector<1x4x64xf32> to vector<4x64xf32>
    %31 = vector.shape_cast %28 : vector<4x64xf32> to vector<1x4x64xf32>
    tpu.vector_store %arg8[%c0_22, %c4_23, %c0_24], %31 {strides = array<i32>} : memref<1x8x64xf32, #tpu.memory_space<vmem>>, vector<1x4x64xf32>,
    return
  }
  func.func @transform_0(%arg0: i32, %arg1: i32) -> (i32, i32, i32) {
    %c0_i32 = arith.constant 0 : i32
    %c0_i32_0 = arith.constant 0 : i32
    return %arg0, %c0_i32, %arg1 : i32, i32, i32
  }
  func.func @transform_1(%arg0: i32, %arg1: i32) -> (i32, i32, i32) {
    %c0_i32 = arith.constant 0 : i32
    %c0_i32_0 = arith.constant 0 : i32
    return %arg0, %c0_i32, %arg1 : i32, i32, i32
  }
  func.func @transform_2(%arg0: i32, %arg1: i32) -> (i32, i32) {
    %c0_i32 = arith.constant 0 : i32
    %c0_i32_0 = arith.constant 0 : i32
    %c0_i32_1 = arith.constant 0 : i32
    return %c0_i32, %c0_i32_0 : i32, i32
  }
  func.func @transform_3(%arg0: i32, %arg1: i32) -> (i32, i32) {
    %c0_i32 = arith.constant 0 : i32
    %c0_i32_0 = arith.constant 0 : i32
    %c0_i32_1 = arith.constant 0 : i32
    return %c0_i32, %c0_i32_0 : i32, i32
  }
  func.func @transform_4(%arg0: i32, %arg1: i32) -> (i32, i32) {
    %c0_i32 = arith.constant 0 : i32
    %c0_i32_0 = arith.constant 0 : i32
    %c0_i32_1 = arith.constant 0 : i32
    return %c0_i32, %c0_i32_0 : i32, i32
  }
  func.func @transform_5(%arg0: i32, %arg1: i32) -> (i32, i32) {
    %c0_i32 = arith.constant 0 : i32
    %c0_i32_0 = arith.constant 0 : i32
    %c0_i32_1 = arith.constant 0 : i32
    return %c0_i32, %c0_i32_0 : i32, i32
  }
  func.func @transform_6(%arg0: i32, %arg1: i32) -> (i32, i32, i32) {
    %c0_i32 = arith.constant 0 : i32
    %c0_i32_0 = arith.constant 0 : i32
    return %arg0, %c0_i32, %arg1 : i32, i32, i32
  }
}

module attributes {stable_mosaic.version = 11 : i64} {
  func.func @_stats_kernel(%arg0: i32, %arg1: i32, %arg2: memref<1x4x64xf32, #tpu.memory_space<vmem>>, %arg3: memref<1x4x64xf32, #tpu.memory_space<vmem>>, %arg4: memref<8x4xf32, #tpu.memory_space<vmem>>, %arg5: memref<8x4xf32, #tpu.memory_space<vmem>>, %arg6: memref<1x1x8x2xf32, #tpu.memory_space<vmem>>) attributes {dimension_semantics = [#tpu.dimension_semantics<parallel>, #tpu.dimension_semantics<parallel>], iteration_bounds = array<i64: 2, 1>, scalar_prefetch = 0 : i64, scratch_operands = 0 : i64, tpu.core_type = #tpu.core_type<tc>, window_params = [{transform_indices = @transform_0, window_bounds = array<i64: 1, 4, 64>}, {transform_indices = @transform_1, window_bounds = array<i64: 1, 4, 64>}, {pipeline_mode = #tpu.pipeline_mode<synchronous>, transform_indices = @transform_2, window_bounds = array<i64: 8, 4>}, {pipeline_mode = #tpu.pipeline_mode<synchronous>, transform_indices = @transform_3, window_bounds = array<i64: 8, 4>}, {transform_indices = @transform_4, window_bounds = array<i64: 1, 1, 8, 2>}]} {
    %c0 = arith.constant 0 : index
    %c0_0 = arith.constant 0 : index
    %c0_1 = arith.constant 0 : index
    %0 = vector.load %arg2[%c0, %c0_0, %c0_1] : memref<1x4x64xf32, #tpu.memory_space<vmem>>, vector<1x4x64xf32>
    %1 = vector.shape_cast %0 : vector<1x4x64xf32> to vector<4x64xf32>
    %cst = arith.constant 0.000000e+00 : f32
    %2 = vector.broadcast %cst : f32 to vector<4x64xf32>
    %3 = arith.maximumf %1, %2 : vector<4x64xf32>
    %c0_2 = arith.constant 0 : index
    %c0_3 = arith.constant 0 : index
    %c0_4 = arith.constant 0 : index
    %4 = vector.load %arg3[%c0_2, %c0_3, %c0_4] : memref<1x4x64xf32, #tpu.memory_space<vmem>>, vector<1x4x64xf32>
    %5 = vector.shape_cast %4 : vector<1x4x64xf32> to vector<4x64xf32>
    %cst_5 = arith.constant 0.000000e+00 : f32
    %6 = vector.broadcast %cst_5 : f32 to vector<4x64xf32>
    %7 = arith.maximumf %5, %6 : vector<4x64xf32>
    %c0_6 = arith.constant 0 : index
    %c0_7 = arith.constant 0 : index
    %8 = vector.load %arg4[%c0_6, %c0_7] : memref<8x4xf32, #tpu.memory_space<vmem>>, vector<8x4xf32>
    %cst_8 = arith.constant dense<0.000000e+00> : vector<8x64xf32>
    %9 = tpu.matmul %8, %3, %cst_8 {dimension_numbers = #tpu.dot_dimension_numbers<[1], [0], [0], [1], [0, 0, 1, 1], [], []>} : vector<8x4xf32>, vector<4x64xf32>, vector<8x64xf32> -> vector<8x64xf32>
    %10 = vector.extract_strided_slice %9 {offsets = [0, 0], sizes = [4, 64], strides = [1, 1]} : vector<8x64xf32> to vector<4x64xf32>
    %c0_9 = arith.constant 0 : index
    %c0_10 = arith.constant 0 : index
    %11 = vector.load %arg5[%c0_9, %c0_10] : memref<8x4xf32, #tpu.memory_space<vmem>>, vector<8x4xf32>
    %cst_11 = arith.constant dense<0.000000e+00> : vector<8x64xf32>
    %12 = tpu.matmul %11, %7, %cst_11 {dimension_numbers = #tpu.dot_dimension_numbers<[1], [0], [0], [1], [0, 0, 1, 1], [], []>} : vector<8x4xf32>, vector<4x64xf32>, vector<8x64xf32> -> vector<8x64xf32>
    %13 = vector.extract_strided_slice %12 {offsets = [0, 0], sizes = [4, 64], strides = [1, 1]} : vector<8x64xf32> to vector<4x64xf32>
    %cst_12 = arith.constant dense<0.000000e+00> : vector<4xf32>
    %14 = vector.multi_reduction <add>, %10, %cst_12 [1] : vector<4x64xf32> to vector<4xf32>
    %15 = vector.shape_cast %14 : vector<4xf32> to vector<4x1xf32>
    %c0_13 = arith.constant 0 : index
    %c0_14 = arith.constant 0 : index
    %c0_15 = arith.constant 0 : index
    %c0_16 = arith.constant 0 : index
    %16 = vector.load %arg6[%c0_13, %c0_14, %c0_15, %c0_16] : memref<1x1x8x2xf32, #tpu.memory_space<vmem>>, vector<1x1x4x1xf32>
    %17 = vector.shape_cast %16 : vector<1x1x4x1xf32> to vector<4x1xf32>
    %18 = vector.shape_cast %15 : vector<4x1xf32> to vector<1x1x4x1xf32>
    tpu.vector_store %arg6[%c0_13, %c0_14, %c0_15, %c0_16], %18 {strides = array<i32>} : memref<1x1x8x2xf32, #tpu.memory_space<vmem>>, vector<1x1x4x1xf32>,
    %cst_17 = arith.constant dense<0.000000e+00> : vector<4xf32>
    %19 = vector.multi_reduction <add>, %13, %cst_17 [1] : vector<4x64xf32> to vector<4xf32>
    %20 = vector.shape_cast %19 : vector<4xf32> to vector<4x1xf32>
    %c0_18 = arith.constant 0 : index
    %c0_19 = arith.constant 0 : index
    %c4 = arith.constant 4 : index
    %c0_20 = arith.constant 0 : index
    %21 = vector.load %arg6[%c0_18, %c0_19, %c4, %c0_20] : memref<1x1x8x2xf32, #tpu.memory_space<vmem>>, vector<1x1x4x1xf32>
    %22 = vector.shape_cast %21 : vector<1x1x4x1xf32> to vector<4x1xf32>
    %23 = vector.shape_cast %20 : vector<4x1xf32> to vector<1x1x4x1xf32>
    tpu.vector_store %arg6[%c0_18, %c0_19, %c4, %c0_20], %23 {strides = array<i32>} : memref<1x1x8x2xf32, #tpu.memory_space<vmem>>, vector<1x1x4x1xf32>,
    %24 = arith.mulf %10, %10 : vector<4x64xf32>
    %cst_21 = arith.constant dense<0.000000e+00> : vector<4xf32>
    %25 = vector.multi_reduction <add>, %24, %cst_21 [1] : vector<4x64xf32> to vector<4xf32>
    %26 = vector.shape_cast %25 : vector<4xf32> to vector<4x1xf32>
    %c0_22 = arith.constant 0 : index
    %c0_23 = arith.constant 0 : index
    %c0_24 = arith.constant 0 : index
    %c1 = arith.constant 1 : index
    %27 = vector.load %arg6[%c0_22, %c0_23, %c0_24, %c1] : memref<1x1x8x2xf32, #tpu.memory_space<vmem>>, vector<1x1x4x1xf32>
    %28 = vector.shape_cast %27 : vector<1x1x4x1xf32> to vector<4x1xf32>
    %29 = vector.shape_cast %26 : vector<4x1xf32> to vector<1x1x4x1xf32>
    tpu.vector_store %arg6[%c0_22, %c0_23, %c0_24, %c1], %29 {strides = array<i32>} : memref<1x1x8x2xf32, #tpu.memory_space<vmem>>, vector<1x1x4x1xf32>,
    %30 = arith.mulf %13, %13 : vector<4x64xf32>
    %cst_25 = arith.constant dense<0.000000e+00> : vector<4xf32>
    %31 = vector.multi_reduction <add>, %30, %cst_25 [1] : vector<4x64xf32> to vector<4xf32>
    %32 = vector.shape_cast %31 : vector<4xf32> to vector<4x1xf32>
    %c0_26 = arith.constant 0 : index
    %c0_27 = arith.constant 0 : index
    %c4_28 = arith.constant 4 : index
    %c1_29 = arith.constant 1 : index
    %33 = vector.load %arg6[%c0_26, %c0_27, %c4_28, %c1_29] : memref<1x1x8x2xf32, #tpu.memory_space<vmem>>, vector<1x1x4x1xf32>
    %34 = vector.shape_cast %33 : vector<1x1x4x1xf32> to vector<4x1xf32>
    %35 = vector.shape_cast %32 : vector<4x1xf32> to vector<1x1x4x1xf32>
    tpu.vector_store %arg6[%c0_26, %c0_27, %c4_28, %c1_29], %35 {strides = array<i32>} : memref<1x1x8x2xf32, #tpu.memory_space<vmem>>, vector<1x1x4x1xf32>,
    return
  }
  func.func @transform_0(%arg0: i32, %arg1: i32) -> (i32, i32, i32) {
    %c0_i32 = arith.constant 0 : i32
    %c0_i32_0 = arith.constant 0 : i32
    return %arg0, %c0_i32, %arg1 : i32, i32, i32
  }
  func.func @transform_1(%arg0: i32, %arg1: i32) -> (i32, i32, i32) {
    %c0_i32 = arith.constant 0 : i32
    %c0_i32_0 = arith.constant 0 : i32
    return %arg0, %c0_i32, %arg1 : i32, i32, i32
  }
  func.func @transform_2(%arg0: i32, %arg1: i32) -> (i32, i32) {
    %c0_i32 = arith.constant 0 : i32
    %c0_i32_0 = arith.constant 0 : i32
    %c0_i32_1 = arith.constant 0 : i32
    return %c0_i32, %c0_i32_0 : i32, i32
  }
  func.func @transform_3(%arg0: i32, %arg1: i32) -> (i32, i32) {
    %c0_i32 = arith.constant 0 : i32
    %c0_i32_0 = arith.constant 0 : i32
    %c0_i32_1 = arith.constant 0 : i32
    return %c0_i32, %c0_i32_0 : i32, i32
  }
  func.func @transform_4(%arg0: i32, %arg1: i32) -> (i32, i32, i32, i32) {
    %c0_i32 = arith.constant 0 : i32
    %c0_i32_0 = arith.constant 0 : i32
    %c0_i32_1 = arith.constant 0 : i32
    return %arg0, %arg1, %c0_i32, %c0_i32_0 : i32, i32, i32, i32
  }
}

</mosaic_0001>

<bundles_post_ra>
// kernel: factorized_reduce.2
= control target key start
LH: loop header
LB: loop body
LE: loop exit
PB: predicated region body
PF: predicated region fallthrough
CT: control target
= control target key end

     0   :  { %s509_s15 = smov 0   ;;  %s511_s16 = smov 0   ;;  %s555_s0 = inlined_call_operand.vmem [shape: f32[2,4,64], index: 0, kind: input, shape index: {}]   ;;  %s556_s1 = inlined_call_operand.vmem [shape: f32[2,4,64], index: 1, kind: input, shape index: {}]   ;;  %s557_s2 = inlined_call_operand.vmem [shape: f32[8,4], index: 2, kind: input, shape index: {}]   ;;  %s558_s3 = inlined_call_operand.vmem [shape: f32[8,4], index: 3, kind: input, shape index: {}]   ;;  %s559_s4 = inlined_call_operand.vmem [shape: f32[2,1,8,2], index: 4, kind: output, shape index: {}]  }
   0x1   :  { %s513_s17 = smov 0  }
   0x2 LB: > { %s26_s18 = sadd.s32 1, %s478_s16  ;;  %p426_p0 = scmp.ge.s32.totalorder %s482_s17, 1  ;;  %s482_s17 = sphi %s513_s17, %s14_s17   ;;  %s478_s16 = sphi %s511_s16, %s561_s16   ;;  %s474_s15 = sphi %s509_s15, %s560_s15  }
   0x3   : > { %p28_p1 = scmp.ge.s32.totalorder %s26_s18, 2  ;;  %p194_p2 = scmp.lt.s32.totalorder %s482_s17, 3 }
   0x5   : > { %s563_s18 = smov (%p28_p1, %s26_s18), 0  ;;  %p195_p3 = pnand %p426_p0, %p194_p2 }
   0x6   : > { %p231_p4 = scmp.lt.s32.totalorder (!%p195_p3), %s474_s15, 1 }
   0x7   : > { %198 = sbr.rel (%p195_p3) target bundleno = 273 (0x111), region = 36 }
   0xc   : > { %s565_s15 = smov (!%p231_p4, %s474_s15), 1  ;;  %vm261_vm0 = vcmask 1043456   ;;  %v256_v3 = vld [vmem:[%s557_s2] sm:$0xff]  ;;  %vm257_vm1 = vcmask 31744   ;;  %vm312_vm2 = vcmask 519168   ;;  %vm316_vm3 = vcmask 3072  }
   0xd   : > { %s427_s19 = sshll.u32 %s565_s15, 2  ;;  %v285_v5 = vld [vmem:[%s558_s3] sm:$0xff]  ;;  %s429_s30 = sshll.u32 %s565_s15, 3  ;;  %vm326_vm4 = vcmask 11272  }
   0xe   : > { %s237_s22 = scalar_lea.vmem %s555_s0, %s427_s19  ;;  %s244_s25 = scalar_lea.vmem %s556_s1, %s427_s19 }
   0xf   : > { %v252_v0 = vld [vmem:[%s237_s22] sm:$0xf]  ;;  %s251_s7 = scalar_lea.vmem %s559_s4, %s429_s30 }
  0x10   : > { %v254_v1 = vld [vmem:[%s244_s25] sm:$0xf]  ;;  %v253_v2 = vmax.f32 %v252_v0, 0.0 }
  0x11   : > { %v255_v4 = vmax.f32 %v254_v1, 0.0 }
  0x12   : > { %430 = vmatpush.msk.msra.mxu0 %vm261_vm0, %v253_v2 }
  0x13   : > { %432 = vmatpush.msk.msra.mxu1 %vm261_vm0, %v255_v4  ;;  %431 = vmatmul.msk.f32.vlgmr.msra.gmra.mxu0 %vm257_vm1, %v256_v3 }
  0x14   : > { %433 = vmatmul.msk.f32.vlgmr.msra.gmra.mxu1 %vm257_vm1, %v285_v5 }
  0x90   : > { %v282_v6 = vpop.f32.mrf.mxu0 }
  0x91   : > { %v322_v7 = vmul.f32 %v282_v6, %v282_v6  ;;  %v313_v8 = vsel %vm312_vm2, %v282_v6, 0.0  ;;  %v309_v9 = vpop.f32.mrf.mxu1 }
  0x92   : > { %314 = vadd.xlane.f32.xlu0 %v313_v8  ;;  %v328_v11 = vmul.f32 %v309_v9, %v309_v9  ;;  %v318_v12 = vsel %vm312_vm2, %v309_v9, 0.0 }
  0x93   : > { %v323_v10 = vsel %vm312_vm2, %v322_v7, 0.0 }
  0x94   : > { %324 = vadd.xlane.f32.xlu1 %v323_v10  ;;  %v329_v13 = vsel %vm312_vm2, %v328_v11, 0.0 }
  0x9a   : > { %319 = vadd.xlane.f32.xlu0 %v318_v12 }
  0x9c   : > { %330 = vadd.xlane.f32.xlu1 %v329_v13 }
 0x105   : > { %v315_v14 = vpop.xlane.xlu0 %314 }
 0x106   : > { %317 = vst.msk [vmem:[%s251_s7] sm:$0xf] %vm316_vm3, %v315_v14 }
 0x107   : > { %v325_v15 = vpop.xlane.xlu1 %324 }
 0x108   : > { %327 = vst.msk [vmem:[%s251_s7] sm:$0xf] %vm326_vm4, %v325_v15 }
 0x10d   : > { %v320_v16 = vpop.xlane.xlu0 %319 }
 0x10e   : > { %321 = vst.msk [vmem:[%s251_s7 + $0x4] sm:$0xf] %vm316_vm3, %v320_v16 }
 0x10f   : > { %v331_v17 = vpop.xlane.xlu1 %330 }
 0x110   : > { %332 = vst.msk [vmem:[%s251_s7 + $0x4] sm:$0xf] %vm326_vm4, %v331_v17 }
 0x111 PF: > { %s14_s17 = sadd.s32 1, %s482_s17   ;;  %s560_s15 = smov %s478_s16 }
 0x112   : > { %p11_p5 = scmp.ge.s32.totalorder %s14_s17, 4   ;;  %s561_s16 = smov %s563_s18 }
 0x114   :  { %13 = sbr.rel (!%p11_p5) target bundleno = 2 (0x2), region = 69 }

// kernel: factorized_reduce.3
= control target key start
LH: loop header
LB: loop body
LE: loop exit
PB: predicated region body
PF: predicated region fallthrough
CT: control target
= control target key end

     0   :  { %s587_s21 = smov 0   ;;  %s589_s22 = smov 0   ;;  %s641_s0 = inlined_call_operand.vmem [shape: f32[2,4,64], index: 0, kind: input, shape index: {}]   ;;  %s642_s1 = inlined_call_operand.vmem [shape: f32[2,4,64], index: 1, kind: input, shape index: {}]   ;;  %s643_s2 = inlined_call_operand.vmem [shape: f32[8,4], index: 2, kind: input, shape index: {}]   ;;  %s644_s3 = inlined_call_operand.vmem [shape: f32[8,4], index: 3, kind: input, shape index: {}]   ;;  %s645_s4 = inlined_call_operand.vmem [shape: f32[8,1], index: 4, kind: input, shape index: {}]   ;;  %s646_s5 = inlined_call_operand.vmem [shape: f32[8,1], index: 5, kind: input, shape index: {}]   ;;  %s647_s6 = inlined_call_operand.vmem [shape: f32[2,8,64], index: 6, kind: output, shape index: {}]  }
   0x1   :  { %s591_s23 = smov 0  }
   0x2 LB: > { %s28_s24 = sadd.s32 1, %s545_s22  ;;  %p490_p0 = scmp.ge.s32.totalorder %s549_s23, 1  ;;  %s549_s23 = sphi %s591_s23, %s16_s23   ;;  %s545_s22 = sphi %s589_s22, %s649_s22   ;;  %s541_s21 = sphi %s587_s21, %s648_s21  }
   0x3   : > { %p30_p1 = scmp.ge.s32.totalorder %s28_s24, 2  ;;  %p244_p2 = scmp.lt.s32.totalorder %s549_s23, 3 }
   0x5   : > { %s651_s24 = smov (%p30_p1, %s28_s24), 0  ;;  %p245_p3 = pnand %p490_p0, %p244_p2 }
   0x6   : > { %p285_p4 = scmp.lt.s32.totalorder (!%p245_p3), %s541_s21, 1 }
   0x7   : > { %248 = sbr.rel (%p245_p3) target bundleno = 151 (0x97), region = 44 }
   0xc   : > { %v366_v0 = vld [vmem:[%s645_s4] sm:$0xf]  ;;  %v551_v2 = vmov 0   ;;  %s653_s21 = smov (!%p285_p4, %s541_s21), 1  ;;  %vm315_vm0 = vcmask 1043456   ;;  %vm311_vm1 = vcmask 31744  }
   0xd   : > { %v373_v1 = vld [vmem:[%s646_s5] sm:$0xf]  ;;  %525 = vset.pattern.permute.xlu0 %v551_v2  ;;  %526 = vset.pattern.permute.xlu1 %v551_v2  ;;  %s491_s29 = sshll.u32 %s653_s21, 2  ;;  %v382_v9 = vld [vmem:[%s645_s4 + $0x4] sm:$0xf]  ;;  %s493_s20 = sshll.u32 %s653_s21, 3 }
   0xe   : > { %369 = vperm.xlu0 %525, %v366_v0   ;;  %376 = vperm.xlu1 %526, %v373_v1   ;;  %s291_s8 = scalar_lea.vmem %s641_s0, %s491_s29  ;;  %s298_s11 = scalar_lea.vmem %s642_s1, %s491_s29  ;;  %v310_v6 = vld [vmem:[%s643_s2] sm:$0xff]  ;;  %vm380_vm2 = vcmask 519168  }
   0xf   : > { %v306_v3 = vld [vmem:[%s291_s8] sm:$0xf]  ;;  %v389_v10 = vld [vmem:[%s646_s5 + $0x4] sm:$0xf]  ;;  %s305_s27 = scalar_lea.vmem %s647_s6, %s493_s20 }
  0x10   : > { %v307_v4 = vmax.f32 %v306_v3, 0.0  ;;  %v308_v5 = vld [vmem:[%s298_s11] sm:$0xf] }
  0x11   : > { %v309_v7 = vmax.f32 %v308_v5, 0.0  ;;  %v339_v8 = vld [vmem:[%s644_s3] sm:$0xff] }
  0x12   : > { %494 = vmatpush.msk.msra.mxu0 %vm315_vm0, %v307_v4 }
  0x13   : > { %496 = vmatpush.msk.msra.mxu1 %vm315_vm0, %v309_v7  ;;  %495 = vmatmul.msk.f32.vlgmr.msra.gmra.mxu0 %vm311_vm1, %v310_v6 }
  0x14   : > { %497 = vmatmul.msk.f32.vlgmr.msra.gmra.mxu1 %vm311_vm1, %v339_v8 }
  0x16   : > { %385 = vperm.xlu0 %525, %v382_v9   ;;  %392 = vperm.xlu1 %526, %v389_v10  }
  0x80   : > { %v370_v11 = vpop.permute.xlu0 %369  ;;  %v377_v12 = vpop.permute.xlu1 %376 }
  0x88   : > { %v386_v14 = vpop.permute.xlu0 %385  ;;  %v393_v18 = vpop.permute.xlu1 %392 }
  0x90   : > { %v336_v13 = vpop.f32.mrf.mxu0 }
  0x91   : > { %v372_v15 = vmul.f32 %v370_v11, %v336_v13  ;;  %v363_v16 = vpop.f32.mrf.mxu1 }
  0x92   : > { %v388_v17 = vmul.f32 %v386_v14, %v363_v16 }
  0x93   : > { %v379_v19 = vadd.f32 %v377_v12, %v372_v15 }
  0x94   : > { %v395_v20 = vadd.f32 %v393_v18, %v388_v17 }
  0x95   : > { %381 = vst.msk [vmem:[%s305_s27] sm:$0xf] %vm380_vm2, %v379_v19 }
  0x96   : > { %396 = vst.msk [vmem:[%s305_s27 + $0x4] sm:$0xf] %vm380_vm2, %v395_v20 }
  0x97 PF: > { %s16_s23 = sadd.s32 1, %s549_s23   ;;  %s648_s21 = smov %s545_s22 }
  0x98   : > { %p13_p5 = scmp.ge.s32.totalorder %s16_s23, 4   ;;  %s649_s22 = smov %s651_s24 }
  0x9a   :  { %15 = sbr.rel (!%p13_p5) target bundleno = 2 (0x2), region = 77 }

</bundles_post_ra>
